<compile_context>
chip_gen: v5e
topology: v5e:2x2
jax: 0.10.0
libtpu: 0.0.40
codegen_flags: <defaults>
</compile_context>

<pallas_src>
import functools

import jax
import jax.numpy as jnp
from jax.experimental import pallas as pl
from jax.experimental.pallas import tpu as pltpu

WINDOW_SIZE = 256


def _pick_batch_block(batch, seq_len, target_rows=256):
    """Smallest divisor of `batch` giving >= target_rows projection rows per grid step."""
    for d in range(1, batch + 1):
        if batch % d == 0 and d * seq_len >= target_rows:
            return d
    return batch


def _longformer_attn_kernel(x_ref, w_ref, bias_ref, o_ref, *, num_heads):
    """One grid point = one block of Bblk batch elements, all heads fused.

    x_ref:    (Bblk, T, D)  input block (f32)
    w_ref:    (D, 3D)       [Wq.T * scale | Wk.T | Wv.T], bf16, scale pre-folded
    bias_ref: (H, T, T)     relative-position bias, bf16
    o_ref:    (Bblk, T, D)  output block, lane-dense (B, T, D) layout
    """
    bblk, t, d = x_ref.shape
    h_num = num_heads
    hd = d // h_num

    # --- fused QKV projection: one wide bf16 MXU matmul, f32 accumulation ----------------
    x2 = x_ref[...].reshape(bblk * t, d).astype(jnp.bfloat16)        # major-dim merge: free
    qkv = jnp.dot(x2, w_ref[...], preferred_element_type=jnp.float32)  # (Bblk*T, 3D) f32
    qkv = qkv.astype(jnp.bfloat16).reshape(bblk, t, 3 * d)           # bf16 operands for attn

    # --- bring heads to a leading batch axis (one gather region, bf16 so copies are small)
    def heads_major(offset):
        parts = [qkv[:, :, offset + h * hd: offset + (h + 1) * hd] for h in range(h_num)]
        # (H, Bblk, T, hd) -> (H*Bblk, T, hd); batch index = h*Bblk + b
        return jnp.stack(parts, axis=0).reshape(h_num * bblk, t, hd)

    q = heads_major(0)          # 1/sqrt(head_dim) already folded into the query weights
    k = heads_major(d)
    v = heads_major(2 * d)

    # --- head-batched QK^T: (H*Bblk, T, T), bf16 in, f32 out ------------------------------
    s = jnp.einsum("bqd,bkd->bqk", q, k, preferred_element_type=jnp.float32)
    s = s.reshape(h_num, bblk, t, t) + bias_ref[...].astype(jnp.float32)[:, None]

    # --- softmax over keys; kept in f32 so the same kernel is v5e-safe --------------------
    m = jnp.max(s, axis=-1, keepdims=True)
    p = jnp.exp(s - m)
    l = jnp.sum(p, axis=-1, keepdims=True)
    attn = (p * pl.reciprocal(l, approx=True)).astype(jnp.bfloat16)

    # --- head-batched attn @ V: bf16 in, f32 out ------------------------------------------
    out = jnp.einsum("bqk,bkd->bqd", attn.reshape(h_num * bblk, t, t), v,
                     preferred_element_type=jnp.float32)             # (H*Bblk, T, hd)
    out = out.reshape(h_num, bblk, t, hd)

    # --- reassemble the (Bblk, T, D) slab and store once, lane-dense ----------------------
    o_ref[...] = jnp.concatenate([out[h] for h in range(h_num)], axis=-1).astype(o_ref.dtype)


def prepare_longformer_params(wq, wk, wv, rel_pos_bias, num_heads, seq_len):
    """One-time (per seq_len) parameter prep, hoisted out of the per-call path.

    Returns:
      w_qkv: (D, 3D) bf16 pre-transposed projection weights, 1/sqrt(hd) folded into Wq cols.
      bias:  (H, T, T) bf16 gathered relative-position bias.
    """
    d = wq.shape[0]
    hd = d // num_heads
    scale = float(hd) ** -0.5
    # nn.Linear: y = x @ W.T  ->  pre-transpose at trace time, fold scale into query cols.
    w_qkv = jnp.concatenate([wq.T * scale, wk.T, wv.T], axis=1).astype(jnp.bfloat16)

    positions = jnp.arange(seq_len)
    rel = positions[None, :] - positions[:, None] + (WINDOW_SIZE - 1)     # (T, T)
    bias = rel_pos_bias[0][:, rel].astype(jnp.bfloat16)                   # (H, T, T)
    return w_qkv, bias


def longformer_attention(x, w_qkv, bias, num_heads):
    """Pallas implementation of LongformerAttention.forward for T <= window_size."""
    b, t, d = x.shape
    h_num = num_heads
    assert d % h_num == 0
    assert t <= WINDOW_SIZE, "reference module only supports a single window (T <= 256)"
    assert w_qkv.shape == (d, 3 * d)
    assert bias.shape == (h_num, t, t)

    bblk = _pick_batch_block(b, t)
    kernel = functools.partial(_longformer_attn_kernel, num_heads=h_num)

    # Block trailing dims below (8,128) always equal the FULL array extent, so the
    # (8,128) divisibility rule is satisfied.
    return pl.pallas_call(
        kernel,
        out_shape=jax.ShapeDtypeStruct((b, t, d), x.dtype),
        grid_spec=pltpu.PrefetchScalarGridSpec(
            num_scalar_prefetch=0,
            grid=(b // bblk,),
            in_specs=[
                pl.BlockSpec((bblk, t, d), lambda i: (i, 0, 0)),     # x block
                pl.BlockSpec((d, 3 * d), lambda i: (0, 0)),          # fused QKV weights (bf16)
                pl.BlockSpec((h_num, t, t), lambda i: (0, 0, 0)),    # rel-pos bias (bf16)
            ],
            out_specs=pl.BlockSpec((bblk, t, d), lambda i: (i, 0, 0)),  # lane-dense (B,T,D)
        ),
        compiler_params=pltpu.CompilerParams(
            dimension_semantics=("parallel",)),
        # Tuning knobs not taken here to keep one portable code path:
        #  - v7x: pipeline_mode=pl.Buffered(1) on the grid-invariant weight/bias blocks and a
        #    second "parallel" head-group grid axis to fill both TensorCores at small B.
        #  - v5e: set vmem_limit_bytes explicitly if T/D grow beyond the 16 MiB scoped default.
    )(x, w_qkv, bias)


def longformer_attention_ref(x, wq, wk, wv, rel_pos_bias, num_heads):
    """Plain-JAX f32 reference mirroring the PyTorch forward (single window)."""
    b, t, d = x.shape
    h_num = num_heads
    hd = d // h_num
    q = (x @ wq.T).reshape(b, t, h_num, hd).transpose(0, 2, 1, 3)
    k = (x @ wk.T).reshape(b, t, h_num, hd).transpose(0, 2, 1, 3)
    v = (x @ wv.T).reshape(b, t, h_num, hd).transpose(0, 2, 1, 3)
    positions = jnp.arange(t)
    rel = positions[None, :] - positions[:, None] + (WINDOW_SIZE - 1)
    bias = rel_pos_bias[:, :, rel]                                        # (1, H, T, T)
    attn = jnp.einsum("bhqd,bhkd->bhqk", q, k) * (float(hd) ** -0.5) + bias
    attn = jax.nn.softmax(attn, axis=-1)
    out = jnp.einsum("bhqk,bhkd->bhqd", attn, v)
    return out.transpose(0, 2, 1, 3).reshape(b, t, d)


if __name__ == "__main__":
    # Small shapes consistent with the module: dim=64, num_heads=8 (default), seq=8.
    B, T, D, H = 2, 8, 64, 8

    key = jax.random.PRNGKey(0)
    kx, kq, kk, kv, kb = jax.random.split(key, 5)
    x = jax.random.normal(kx, (B, T, D), jnp.float32)
    wq = jax.random.normal(kq, (D, D), jnp.float32) * 0.1
    wk = jax.random.normal(kk, (D, D), jnp.float32) * 0.1
    wv = jax.random.normal(kv, (D, D), jnp.float32) * 0.1
    rel_pos_bias = jax.random.normal(kb, (1, H, 2 * WINDOW_SIZE - 1), jnp.float32)

    # Hoisted, once-per-shape parameter prep (weight fuse/transpose/bf16 cast + bias gather).
    w_qkv, bias = prepare_longformer_params(wq, wk, wv, rel_pos_bias, H, T)

    out = jax.block_until_ready(longformer_attention(x, w_qkv, bias, H))

    ref = longformer_attention_ref(x, wq, wk, wv, rel_pos_bias, H)
    assert out.shape == (B, T, D)
    # bf16 MXU operands / bf16 bias + approx softmax reciprocal -> loose tolerance vs f32 ref.
    max_err = float(jnp.max(jnp.abs(out - ref)))
    assert jnp.allclose(out, ref, atol=5e-2, rtol=5e-2), f"mismatch vs reference: {max_err}"

    print("KERNEL_OK")
</pallas_src>

<mosaic_0001>
module attributes {stable_mosaic.version = 11 : i64} {
  func.func @_longformer_attn_kernel(%arg0: i32, %arg1: memref<2x8x64xf32, #tpu.memory_space<vmem>>, %arg2: memref<64x192xbf16, #tpu.memory_space<vmem>>, %arg3: memref<8x8x8xbf16, #tpu.memory_space<vmem>>, %arg4: memref<2x8x64xf32, #tpu.memory_space<vmem>>) attributes {dimension_semantics = [#tpu.dimension_semantics<parallel>], iteration_bounds = array<i64: 1>, scalar_prefetch = 0 : i64, scratch_operands = 0 : i64, tpu.core_type = #tpu.core_type<tc>, window_params = [{transform_indices = @transform_0, window_bounds = array<i64: 2, 8, 64>}, {pipeline_mode = #tpu.pipeline_mode<synchronous>, transform_indices = @transform_1, window_bounds = array<i64: 64, 192>}, {pipeline_mode = #tpu.pipeline_mode<synchronous>, transform_indices = @transform_2, window_bounds = array<i64: 8, 8, 8>}, {transform_indices = @transform_3, window_bounds = array<i64: 2, 8, 64>}]} {
    %c0 = arith.constant 0 : index
    %c0_0 = arith.constant 0 : index
    %c0_1 = arith.constant 0 : index
    %0 = vector.load %arg1[%c0, %c0_0, %c0_1] : memref<2x8x64xf32, #tpu.memory_space<vmem>>, vector<2x8x64xf32>
    %1 = vector.shape_cast %0 : vector<2x8x64xf32> to vector<16x64xf32>
    %2 = arith.truncf %1 : vector<16x64xf32> to vector<16x64xbf16>
    %c0_2 = arith.constant 0 : index
    %c0_3 = arith.constant 0 : index
    %3 = vector.load %arg2[%c0_2, %c0_3] : memref<64x192xbf16, #tpu.memory_space<vmem>>, vector<64x192xbf16>
    %cst = arith.constant dense<0.000000e+00> : vector<16x192xf32>
    %4 = tpu.matmul %2, %3, %cst {dimension_numbers = #tpu.dot_dimension_numbers<[1], [0], [0], [1], [0, 0, 1, 1], [], []>} : vector<16x64xbf16>, vector<64x192xbf16>, vector<16x192xf32> -> vector<16x192xf32>
    %5 = arith.truncf %4 : vector<16x192xf32> to vector<16x192xbf16>
    %6 = vector.shape_cast %5 : vector<16x192xbf16> to vector<2x8x192xbf16>
    %7 = vector.extract_strided_slice %6 {offsets = [0, 0, 0], sizes = [2, 8, 8], strides = [1, 1, 1]} : vector<2x8x192xbf16> to vector<2x8x8xbf16>
    %8 = vector.extract_strided_slice %6 {offsets = [0, 0, 8], sizes = [2, 8, 8], strides = [1, 1, 1]} : vector<2x8x192xbf16> to vector<2x8x8xbf16>
    %9 = vector.extract_strided_slice %6 {offsets = [0, 0, 16], sizes = [2, 8, 8], strides = [1, 1, 1]} : vector<2x8x192xbf16> to vector<2x8x8xbf16>
    %10 = vector.extract_strided_slice %6 {offsets = [0, 0, 24], sizes = [2, 8, 8], strides = [1, 1, 1]} : vector<2x8x192xbf16> to vector<2x8x8xbf16>
    %11 = vector.extract_strided_slice %6 {offsets = [0, 0, 32], sizes = [2, 8, 8], strides = [1, 1, 1]} : vector<2x8x192xbf16> to vector<2x8x8xbf16>
    %12 = vector.extract_strided_slice %6 {offsets = [0, 0, 40], sizes = [2, 8, 8], strides = [1, 1, 1]} : vector<2x8x192xbf16> to vector<2x8x8xbf16>
    %13 = vector.extract_strided_slice %6 {offsets = [0, 0, 48], sizes = [2, 8, 8], strides = [1, 1, 1]} : vector<2x8x192xbf16> to vector<2x8x8xbf16>
    %14 = vector.extract_strided_slice %6 {offsets = [0, 0, 56], sizes = [2, 8, 8], strides = [1, 1, 1]} : vector<2x8x192xbf16> to vector<2x8x8xbf16>
    %15 = vector.shape_cast %7 : vector<2x8x8xbf16> to vector<1x2x8x8xbf16>
    %16 = vector.shape_cast %8 : vector<2x8x8xbf16> to vector<1x2x8x8xbf16>
    %17 = vector.shape_cast %9 : vector<2x8x8xbf16> to vector<1x2x8x8xbf16>
    %18 = vector.shape_cast %10 : vector<2x8x8xbf16> to vector<1x2x8x8xbf16>
    %19 = vector.shape_cast %11 : vector<2x8x8xbf16> to vector<1x2x8x8xbf16>
    %20 = vector.shape_cast %12 : vector<2x8x8xbf16> to vector<1x2x8x8xbf16>
    %21 = vector.shape_cast %13 : vector<2x8x8xbf16> to vector<1x2x8x8xbf16>
    %22 = vector.shape_cast %14 : vector<2x8x8xbf16> to vector<1x2x8x8xbf16>
    %23 = tpu.concatenate %15, %16, %17, %18, %19, %20, %21, %22 in 0 : vector<1x2x8x8xbf16>, vector<1x2x8x8xbf16>, vector<1x2x8x8xbf16>, vector<1x2x8x8xbf16>, vector<1x2x8x8xbf16>, vector<1x2x8x8xbf16>, vector<1x2x8x8xbf16>, vector<1x2x8x8xbf16> -> vector<8x2x8x8xbf16>
    %24 = vector.shape_cast %23 : vector<8x2x8x8xbf16> to vector<16x8x8xbf16>
    %25 = vector.extract_strided_slice %6 {offsets = [0, 0, 64], sizes = [2, 8, 8], strides = [1, 1, 1]} : vector<2x8x192xbf16> to vector<2x8x8xbf16>
    %26 = vector.extract_strided_slice %6 {offsets = [0, 0, 72], sizes = [2, 8, 8], strides = [1, 1, 1]} : vector<2x8x192xbf16> to vector<2x8x8xbf16>
    %27 = vector.extract_strided_slice %6 {offsets = [0, 0, 80], sizes = [2, 8, 8], strides = [1, 1, 1]} : vector<2x8x192xbf16> to vector<2x8x8xbf16>
    %28 = vector.extract_strided_slice %6 {offsets = [0, 0, 88], sizes = [2, 8, 8], strides = [1, 1, 1]} : vector<2x8x192xbf16> to vector<2x8x8xbf16>
    %29 = vector.extract_strided_slice %6 {offsets = [0, 0, 96], sizes = [2, 8, 8], strides = [1, 1, 1]} : vector<2x8x192xbf16> to vector<2x8x8xbf16>
    %30 = vector.extract_strided_slice %6 {offsets = [0, 0, 104], sizes = [2, 8, 8], strides = [1, 1, 1]} : vector<2x8x192xbf16> to vector<2x8x8xbf16>
    %31 = vector.extract_strided_slice %6 {offsets = [0, 0, 112], sizes = [2, 8, 8], strides = [1, 1, 1]} : vector<2x8x192xbf16> to vector<2x8x8xbf16>
    %32 = vector.extract_strided_slice %6 {offsets = [0, 0, 120], sizes = [2, 8, 8], strides = [1, 1, 1]} : vector<2x8x192xbf16> to vector<2x8x8xbf16>
    %33 = vector.shape_cast %25 : vector<2x8x8xbf16> to vector<1x2x8x8xbf16>
    %34 = vector.shape_cast %26 : vector<2x8x8xbf16> to vector<1x2x8x8xbf16>
    %35 = vector.shape_cast %27 : vector<2x8x8xbf16> to vector<1x2x8x8xbf16>
    %36 = vector.shape_cast %28 : vector<2x8x8xbf16> to vector<1x2x8x8xbf16>
    %37 = vector.shape_cast %29 : vector<2x8x8xbf16> to vector<1x2x8x8xbf16>
    %38 = vector.shape_cast %30 : vector<2x8x8xbf16> to vector<1x2x8x8xbf16>
    %39 = vector.shape_cast %31 : vector<2x8x8xbf16> to vector<1x2x8x8xbf16>
    %40 = vector.shape_cast %32 : vector<2x8x8xbf16> to vector<1x2x8x8xbf16>
    %41 = tpu.concatenate %33, %34, %35, %36, %37, %38, %39, %40 in 0 : vector<1x2x8x8xbf16>, vector<1x2x8x8xbf16>, vector<1x2x8x8xbf16>, vector<1x2x8x8xbf16>, vector<1x2x8x8xbf16>, vector<1x2x8x8xbf16>, vector<1x2x8x8xbf16>, vector<1x2x8x8xbf16> -> vector<8x2x8x8xbf16>
    %42 = vector.shape_cast %41 : vector<8x2x8x8xbf16> to vector<16x8x8xbf16>
    %43 = vector.extract_strided_slice %6 {offsets = [0, 0, 128], sizes = [2, 8, 8], strides = [1, 1, 1]} : vector<2x8x192xbf16> to vector<2x8x8xbf16>
    %44 = vector.extract_strided_slice %6 {offsets = [0, 0, 136], sizes = [2, 8, 8], strides = [1, 1, 1]} : vector<2x8x192xbf16> to vector<2x8x8xbf16>
    %45 = vector.extract_strided_slice %6 {offsets = [0, 0, 144], sizes = [2, 8, 8], strides = [1, 1, 1]} : vector<2x8x192xbf16> to vector<2x8x8xbf16>
    %46 = vector.extract_strided_slice %6 {offsets = [0, 0, 152], sizes = [2, 8, 8], strides = [1, 1, 1]} : vector<2x8x192xbf16> to vector<2x8x8xbf16>
    %47 = vector.extract_strided_slice %6 {offsets = [0, 0, 160], sizes = [2, 8, 8], strides = [1, 1, 1]} : vector<2x8x192xbf16> to vector<2x8x8xbf16>
    %48 = vector.extract_strided_slice %6 {offsets = [0, 0, 168], sizes = [2, 8, 8], strides = [1, 1, 1]} : vector<2x8x192xbf16> to vector<2x8x8xbf16>
    %49 = vector.extract_strided_slice %6 {offsets = [0, 0, 176], sizes = [2, 8, 8], strides = [1, 1, 1]} : vector<2x8x192xbf16> to vector<2x8x8xbf16>
    %50 = vector.extract_strided_slice %6 {offsets = [0, 0, 184], sizes = [2, 8, 8], strides = [1, 1, 1]} : vector<2x8x192xbf16> to vector<2x8x8xbf16>
    %51 = vector.shape_cast %43 : vector<2x8x8xbf16> to vector<1x2x8x8xbf16>
    %52 = vector.shape_cast %44 : vector<2x8x8xbf16> to vector<1x2x8x8xbf16>
    %53 = vector.shape_cast %45 : vector<2x8x8xbf16> to vector<1x2x8x8xbf16>
    %54 = vector.shape_cast %46 : vector<2x8x8xbf16> to vector<1x2x8x8xbf16>
    %55 = vector.shape_cast %47 : vector<2x8x8xbf16> to vector<1x2x8x8xbf16>
    %56 = vector.shape_cast %48 : vector<2x8x8xbf16> to vector<1x2x8x8xbf16>
    %57 = vector.shape_cast %49 : vector<2x8x8xbf16> to vector<1x2x8x8xbf16>
    %58 = vector.shape_cast %50 : vector<2x8x8xbf16> to vector<1x2x8x8xbf16>
    %59 = tpu.concatenate %51, %52, %53, %54, %55, %56, %57, %58 in 0 : vector<1x2x8x8xbf16>, vector<1x2x8x8xbf16>, vector<1x2x8x8xbf16>, vector<1x2x8x8xbf16>, vector<1x2x8x8xbf16>, vector<1x2x8x8xbf16>, vector<1x2x8x8xbf16>, vector<1x2x8x8xbf16> -> vector<8x2x8x8xbf16>
    %60 = vector.shape_cast %59 : vector<8x2x8x8xbf16> to vector<16x8x8xbf16>
    "tpu.trace_start"() <{level = 10 : i32, message = "bqd,bkd->bqk"}> : () -> ()
    %cst_4 = arith.constant dense<0.000000e+00> : vector<16x8x8xf32>
    %61 = tpu.matmul %24, %42, %cst_4 {dimension_numbers = #tpu.dot_dimension_numbers<[2], [2], [1], [1], [0, 0, 0, 1, 1, 1], [0], [0]>} : vector<16x8x8xbf16>, vector<16x8x8xbf16>, vector<16x8x8xf32> -> vector<16x8x8xf32>
    "tpu.trace_stop"() : () -> ()
    %62 = vector.shape_cast %61 : vector<16x8x8xf32> to vector<8x2x8x8xf32>
    %c0_5 = arith.constant 0 : index
    %c0_6 = arith.constant 0 : index
    %c0_7 = arith.constant 0 : index
    %63 = vector.load %arg3[%c0_5, %c0_6, %c0_7] : memref<8x8x8xbf16, #tpu.memory_space<vmem>>, vector<8x8x8xbf16>
    %64 = arith.extf %63 : vector<8x8x8xbf16> to vector<8x8x8xf32>
    %65 = vector.shape_cast %64 : vector<8x8x8xf32> to vector<8x1x8x8xf32>
    %66 = vector.broadcast %65 : vector<8x1x8x8xf32> to vector<8x2x8x8xf32>
    %67 = arith.addf %62, %66 : vector<8x2x8x8xf32>
    %cst_8 = arith.constant dense<0xFF800000> : vector<8x2x8xf32>
    %68 = vector.multi_reduction <maximumf>, %67, %cst_8 [3] : vector<8x2x8x8xf32> to vector<8x2x8xf32>
    %69 = vector.shape_cast %68 : vector<8x2x8xf32> to vector<8x2x8x1xf32>
    %70 = vector.broadcast %69 : vector<8x2x8x1xf32> to vector<8x2x8x8xf32>
    %71 = arith.subf %67, %70 : vector<8x2x8x8xf32>
    %72 = math.exp %71 : vector<8x2x8x8xf32>
    %cst_9 = arith.constant dense<0.000000e+00> : vector<8x2x8xf32>
    %73 = vector.multi_reduction <add>, %72, %cst_9 [3] : vector<8x2x8x8xf32> to vector<8x2x8xf32>
    %74 = vector.shape_cast %73 : vector<8x2x8xf32> to vector<8x2x8x1xf32>
    %75 = tpu.reciprocal %74 {approx = true} : vector<8x2x8x1xf32> -> vector<8x2x8x1xf32>
    %76 = vector.broadcast %75 : vector<8x2x8x1xf32> to vector<8x2x8x8xf32>
    %77 = arith.mulf %72, %76 : vector<8x2x8x8xf32>
    %78 = arith.truncf %77 : vector<8x2x8x8xf32> to vector<8x2x8x8xbf16>
    %79 = vector.shape_cast %78 : vector<8x2x8x8xbf16> to vector<16x8x8xbf16>
    "tpu.trace_start"() <{level = 10 : i32, message = "bqk,bkd->bqd"}> : () -> ()
    %cst_10 = arith.constant dense<0.000000e+00> : vector<16x8x8xf32>
    %80 = tpu.matmul %79, %60, %cst_10 {dimension_numbers = #tpu.dot_dimension_numbers<[2], [1], [1], [2], [0, 0, 0, 1, 1, 2], [0], [0]>} : vector<16x8x8xbf16>, vector<16x8x8xbf16>, vector<16x8x8xf32> -> vector<16x8x8xf32>
    "tpu.trace_stop"() : () -> ()
    %81 = vector.shape_cast %80 : vector<16x8x8xf32> to vector<8x2x8x8xf32>
    %82 = vector.extract_strided_slice %81 {offsets = [0, 0, 0, 0], sizes = [1, 2, 8, 8], strides = [1, 1, 1, 1]} : vector<8x2x8x8xf32> to vector<1x2x8x8xf32>
    %83 = vector.shape_cast %82 : vector<1x2x8x8xf32> to vector<2x8x8xf32>
    %84 = vector.extract_strided_slice %81 {offsets = [1, 0, 0, 0], sizes = [1, 2, 8, 8], strides = [1, 1, 1, 1]} : vector<8x2x8x8xf32> to vector<1x2x8x8xf32>
    %85 = vector.shape_cast %84 : vector<1x2x8x8xf32> to vector<2x8x8xf32>
    %86 = vector.extract_strided_slice %81 {offsets = [2, 0, 0, 0], sizes = [1, 2, 8, 8], strides = [1, 1, 1, 1]} : vector<8x2x8x8xf32> to vector<1x2x8x8xf32>
    %87 = vector.shape_cast %86 : vector<1x2x8x8xf32> to vector<2x8x8xf32>
    %88 = vector.extract_strided_slice %81 {offsets = [3, 0, 0, 0], sizes = [1, 2, 8, 8], strides = [1, 1, 1, 1]} : vector<8x2x8x8xf32> to vector<1x2x8x8xf32>
    %89 = vector.shape_cast %88 : vector<1x2x8x8xf32> to vector<2x8x8xf32>
    %90 = vector.extract_strided_slice %81 {offsets = [4, 0, 0, 0], sizes = [1, 2, 8, 8], strides = [1, 1, 1, 1]} : vector<8x2x8x8xf32> to vector<1x2x8x8xf32>
    %91 = vector.shape_cast %90 : vector<1x2x8x8xf32> to vector<2x8x8xf32>
    %92 = vector.extract_strided_slice %81 {offsets = [5, 0, 0, 0], sizes = [1, 2, 8, 8], strides = [1, 1, 1, 1]} : vector<8x2x8x8xf32> to vector<1x2x8x8xf32>
    %93 = vector.shape_cast %92 : vector<1x2x8x8xf32> to vector<2x8x8xf32>
    %94 = vector.extract_strided_slice %81 {offsets = [6, 0, 0, 0], sizes = [1, 2, 8, 8], strides = [1, 1, 1, 1]} : vector<8x2x8x8xf32> to vector<1x2x8x8xf32>
    %95 = vector.shape_cast %94 : vector<1x2x8x8xf32> to vector<2x8x8xf32>
    %96 = vector.extract_strided_slice %81 {offsets = [7, 0, 0, 0], sizes = [1, 2, 8, 8], strides = [1, 1, 1, 1]} : vector<8x2x8x8xf32> to vector<1x2x8x8xf32>
    %97 = vector.shape_cast %96 : vector<1x2x8x8xf32> to vector<2x8x8xf32>
    %98 = tpu.concatenate %83, %85, %87, %89, %91, %93, %95, %97 in 2 : vector<2x8x8xf32>, vector<2x8x8xf32>, vector<2x8x8xf32>, vector<2x8x8xf32>, vector<2x8x8xf32>, vector<2x8x8xf32>, vector<2x8x8xf32>, vector<2x8x8xf32> -> vector<2x8x64xf32>
    %c0_11 = arith.constant 0 : index
    %c0_12 = arith.constant 0 : index
    %c0_13 = arith.constant 0 : index
    %99 = vector.load %arg4[%c0_11, %c0_12, %c0_13] : memref<2x8x64xf32, #tpu.memory_space<vmem>>, vector<2x8x64xf32>
    tpu.vector_store %arg4[%c0_11, %c0_12, %c0_13], %98 {strides = array<i32>} : memref<2x8x64xf32, #tpu.memory_space<vmem>>, vector<2x8x64xf32>,
    return
  }
  func.func @transform_0(%arg0: i32) -> (i32, i32, i32) {
    %c0_i32 = arith.constant 0 : i32
    %c0_i32_0 = arith.constant 0 : i32
    %c0_i32_1 = arith.constant 0 : i32
    return %arg0, %c0_i32, %c0_i32_0 : i32, i32, i32
  }
  func.func @transform_1(%arg0: i32) -> (i32, i32) {
    %c0_i32 = arith.constant 0 : i32
    %c0_i32_0 = arith.constant 0 : i32
    %c0_i32_1 = arith.constant 0 : i32
    return %c0_i32, %c0_i32_0 : i32, i32
  }
  func.func @transform_2(%arg0: i32) -> (i32, i32, i32) {
    %c0_i32 = arith.constant 0 : i32
    %c0_i32_0 = arith.constant 0 : i32
    %c0_i32_1 = arith.constant 0 : i32
    %c0_i32_2 = arith.constant 0 : i32
    return %c0_i32, %c0_i32_0, %c0_i32_1 : i32, i32, i32
  }
  func.func @transform_3(%arg0: i32) -> (i32, i32, i32) {
    %c0_i32 = arith.constant 0 : i32
    %c0_i32_0 = arith.constant 0 : i32
    %c0_i32_1 = arith.constant 0 : i32
    return %arg0, %c0_i32, %c0_i32_0 : i32, i32, i32
  }
}

</mosaic_0001>

<bundles_post_ra>
// kernel: tpu_custom_call.1
= control target key start
LH: loop header
LB: loop body
LE: loop exit
PB: predicated region body
PF: predicated region fallthrough
CT: control target
= control target key end

     0   :  { %8 = vsyncpa [#allocation3], 0  ;;  %s1895_s0 = inlined_call_operand.hbm [shape: f32[2,8,64], index: 0, kind: input, shape index: {}]   ;;  %s1896_s1 = inlined_call_operand.hbm [shape: bf16[64,192], index: 1, kind: input, shape index: {}]   ;;  %s1897_s2 = inlined_call_operand.hbm [shape: bf16[8,8,8], index: 2, kind: input, shape index: {}]   ;;  %s1898_s3 = inlined_call_operand.hbm [shape: f32[2,8,64], index: 3, kind: output, shape index: {}]  }
   0x1   :  { %9 = vsyncpa [#allocation6], 0 }
   0x2   :  { %10 = vsyncpa [#allocation4], 0  ;;  %s28_s14 = sshll.u32 %s1896_s1, 4  ;;  %s1470_s15 = smov [#allocation5]   ;;  %s29_s14 = int_to_ptr.hbm [resolvable:$true] %s28_s14 }
   0x3   :  { %s30_s16 = sshll.u32 %s1470_s15, 4  ;;  %s15_s19 = sshll.u32 %s1895_s0, 4  ;;  %s31_s16 = int_to_ptr.vmem [resolvable:$true] %s30_s16  ;;  %s16_s19 = int_to_ptr.hbm [resolvable:$true] %s15_s19 }
   0x4   :  { %s1471_s20 = smov 128   ;;  %s1472_s21 = smov 8  }
   0x5   :  { %36 = dma.hbm_to_vmem [thread:$0]  %s29_s14, 1024, %s31_s16, [#allocation6], %s1471_s20, %s1471_s20, %s1472_s21  }
   0x6   :  { %s1473_s22 = smov [#allocation2]   ;;  %s41_s1 = sshll.u32 %s1897_s2, 4  ;;  %s42_s1 = int_to_ptr.hbm [resolvable:$true] %s41_s1 }
   0x7   :  { %s17_s23 = sshll.u32 %s1473_s22, 4  ;;  %s1474_s0 = smov [#allocation7]   ;;  %s18_s23 = int_to_ptr.vmem [resolvable:$true] %s17_s23 }
   0x8   :  { %23 = dma.hbm_to_vmem [thread:$0]  %s16_s19, 256, %s18_s23, [#allocation3], %s1471_s20, %s1471_s20, %s1472_s21  }
   0x9   :  { %s43_s26 = sshll.u32 %s1474_s0, 4  ;;  %s1475_s27 = smov 64   ;;  %s44_s26 = int_to_ptr.vmem [resolvable:$true] %s43_s26 }
   0xa   :  { %s1476_s28 = smov 4  }
   0xb   :  { %49 = dma.hbm_to_vmem [thread:$0]  %s42_s1, 512, %s44_s26, [#allocation6], %s1475_s27, %s1475_s27, %s1476_s28  }
   0xc   :  { %1464 = dma.done.wait [#allocation3], 256  }
   0xd   :  { %1465 = vsyncadd [#allocation3], 4294967040 }
   0xe   :  { %1466 = dma.done.wait [#allocation6], 1536  }
   0xf   :  { %1467 = vsyncadd [#allocation6], 4294965760  ;;  %v1216_v0 = vld [vmem:[#allocation5 + $0x30] sm:$0xf]  ;;  %v1263_v1 = vld [vmem:[#allocation5 + $0x34] sm:$0xf0] }
  0x10   :  { %v1262_v2 = vld [vmem:[#allocation5 + $0x34] sm:$0xf]  ;;  %v1217_v3 = vor.u32 %v1263_v1, %v1216_v0  ;;  %v1218_v4 = vld [vmem:[#allocation5 + $0x38] sm:$0xf0]  ;;  %v1208_v5 = vld [vmem:[#allocation5 + $0x20] sm:$0xf] }
  0x11   :  { %v1261_v6 = vld [vmem:[#allocation5 + $0x24] sm:$0xf0]  ;;  %v1221_v7 = vor.u32 %v1262_v2, %v1218_v4  ;;  %v1260_v8 = vld [vmem:[#allocation5 + $0x24] sm:$0xf]  ;;  %v1210_v9 = vld [vmem:[#allocation5 + $0x28] sm:$0xf0] }
  0x12   :  { %122 = vmatpush.bf16.msra.mxu0 %v1217_v3  ;;  %v1209_v10 = vor.u32 %v1261_v6, %v1208_v5  ;;  %v1213_v11 = vor.u32 %v1260_v8, %v1210_v9  ;;  %v1200_v12 = vld [vmem:[#allocation5 + $0x10] sm:$0xf]  ;;  %v1259_v13 = vld [vmem:[#allocation5 + $0x14] sm:$0xf0]  ;;  %v1258_v14 = vld [vmem:[#allocation5 + $0x14] sm:$0xf] }
  0x13   :  { %136 = vmatpush.bf16.msra.mxu1 %v1221_v7  ;;  %v1202_v15 = vld [vmem:[#allocation5 + $0x18] sm:$0xf0]  ;;  %v1201_v16 = vor.u32 %v1259_v13, %v1200_v12  ;;  %v1192_v18 = vld [vmem:[#allocation5] sm:$0xf]  ;;  %v1257_v19 = vld [vmem:[#allocation5 + $0x4] sm:$0xf0] }
  0x14   :  { %v1205_v17 = vor.u32 %v1258_v14, %v1202_v15  ;;  %v1256_v20 = vld [vmem:[#allocation5 + $0x4] sm:$0xf]  ;;  %v1194_v21 = vld [vmem:[#allocation5 + $0x8] sm:$0xf0]  ;;  %v1193_v22 = vor.u32 %v1257_v19, %v1192_v18  ;;  %v63_v23 = vld [vmem:[#allocation2] sm:$0xff]  ;;  %vm114_vm0 = vcmask 523264  }
  0x15   :  { %v64_v24 = vld [vmem:[#allocation2 + $0x8] sm:$0xff]  ;;  %v1197_v25 = vor.u32 %v1256_v20, %v1194_v21  ;;  %s1477_s2 = smov 112   ;;  %s1478_s29 = smov 104   ;;  %vm198_vm1 = vcmask 64512   ;;  %vm790_vm2 = vcmask 1043456   ;;  %vm1150_vm3 = vcmask 130048  }
  0x16   :  { %123 = vmatpush.bf16.msra.mxu0 %v1209_v10  ;;  %v65_v26 = vpack.c.bf16 %v64_v24, %v63_v23  ;;  %s1479_s30 = smov 120   ;;  %s1480_s4 = smov 88   ;;  %vm1153_vm4 = vcmask 195584   ;;  %vm1156_vm5 = vcmask 261120   ;;  %vm1159_vm6 = vcmask 326656  }
  0x17   :  { %137 = vmatpush.bf16.msra.mxu1 %v1213_v11  ;;  %s1481_s5 = smov 96   ;;  %s1482_s6 = smov 72   ;;  %vm1165_vm7 = vcmask 457728   ;;  %vm1162_vm8 = vcmask 392192  }
  0x18   :  { %s1483_s7 = smov 80   ;;  %s1484_s8 = smov 24  }
  0x19   :  { %s1485_s9 = smov 16   ;;  %s1486_s10 = smov 40  }
  0x1a   :  { %124 = vmatpush.bf16.msra.mxu0 %v1201_v16  ;;  %s1487_s11 = smov 32   ;;  %s1488_s12 = smov 56  }
  0x1b   :  { %138 = vmatpush.bf16.msra.mxu1 %v1205_v17  ;;  %s1489_s13 = smov 48   ;;  %s1490_s14 = smov [#allocation8]  }
  0x1c   :  { %s1174_s15 = sshll.u32 %s1490_s14, 4  ;;  %s1176_s18 = sshll.u32 %s1898_s3, 4  ;;  %s1175_s15 = int_to_ptr.vmem [resolvable:$true] %s1174_s15  ;;  %s1177_s18 = int_to_ptr.hbm [resolvable:$true] %s1176_s18 }
  0x1e   :  { %125 = vmatpush.bf16.msra.mxu0 %v1193_v22 }
  0x1f   :  { %139 = vmatpush.bf16.msra.mxu1 %v1197_v25 }
  0x21   :  { %1222 = vmatmul.msk.bf16.vlgmr.msra.gmra.mxu0 %vm114_vm0, %v65_v26 }
  0x22   :  { %1223 = vmatmul.msk.bf16.vlgmr.msra.gmra.mxu1 %vm114_vm0, %v65_v26 }
  0x9e   :  { %v127_v27 = vpop.f32.mrf.mxu0 }
  0x9f   :  { %v141_v28 = vpop.f32.mrf.mxu1 }
  0xa0   :  { %v1530_v29 = vpack.c.bf16 %v141_v28, %v127_v27 }
  0xa2   :  { %154 = vrot.lane.b32.xlu2 %v1530_v29, %s1477_s2  ;;  %158 = vrot.lane.b32.xlu1 %v1530_v29, %s1478_s29  ;;  %v194_v34 = vunpack.c.l.b16 %v1530_v29 }
  0xa3   :  { %150 = vrot.lane.b32.xlu0 %v1530_v29, %s1479_s30 }
  0xa4   :  { %v195_v36 = vpack.c.b16 %v194_v34, %v194_v34 }
  0xa6   :  { %v129_v30 = vpop.f32.mrf.mxu0 }
  0xa7   :  { %v143_v31 = vpop.f32.mrf.mxu1 }
  0xa8   :  { %v1535_v32 = vpack.c.bf16 %v143_v31, %v129_v30 }
  0xaa   :  { %156 = vrot.lane.b32.xlu2 %v1535_v32, %s1477_s2  ;;  %160 = vrot.lane.b32.xlu1 %v1535_v32, %s1478_s29  ;;  %v218_v33 = vunpack.c.l.b16 %v1535_v32 }
  0xab   :  { %152 = vrot.lane.b32.xlu0 %v1535_v32, %s1479_s30 }
  0xac   :  { %v219_v35 = vpack.c.b16 %v218_v33, %v218_v33 }
  0xb2   :  { %166 = vrot.lane.b32.xlu2 %v1530_v29, %s1480_s4  ;;  %220 = vrot.lane.b32.xlu1 %v219_v35, %s1475_s27 }
  0xb3   :  { %196 = vrot.lane.b32.xlu0 %v195_v36, %s1475_s27  ;;  %v1631_v36 = vld [vmem:[#allocation7] sm:$0xff]  }
  0xba   :  { %164 = vrot.lane.b32.xlu2 %v1535_v32, %s1481_s5  ;;  %162 = vrot.lane.b32.xlu1 %v1530_v29, %s1481_s5 }
  0xbb   :  { %168 = vrot.lane.b32.xlu0 %v1535_v32, %s1480_s4 }
  0xc2   :  { %174 = vrot.lane.b32.xlu2 %v1530_v29, %s1482_s6 }
  0xca   :  { %172 = vrot.lane.b32.xlu2 %v1535_v32, %s1483_s7 }
  0xfc   :  { %v1551_v37 = vpop.permute.xlu2 %154 }
  0xfd   :  { %v287_v38 = vunpack.c.l.b16 %v1551_v37 }
  0xff   :  { %v288_v39 = vpack.c.b16 %v287_v38, %v287_v38 }
 0x101   :  { %289 = vrot.lane.b32.xlu2 %v288_v39, %s1475_s27 }
 0x104   :  { %v1555_v40 = vpop.permute.xlu2 %156 }
 0x105   :  { %v310_v57 = vunpack.c.l.b16 %v1555_v40 }
 0x107   :  { %v311_v62 = vpack.c.b16 %v310_v57, %v310_v57 }
 0x10c   :  { %v1563_v45 = vpop.permute.xlu2 %166 }
 0x10d   :  { %v425_v4 = vunpack.c.l.b16 %v1563_v45 }
 0x10f   :  { %v426_v8 = vpack.c.b16 %v425_v4, %v425_v4 }
 0x114   :  { %v1557_v41 = vpop.permute.xlu1 %158  ;;  %v1573_v52 = vpop.permute.xlu2 %164 }
 0x115   :  { %v1559_v42 = vpop.permute.xlu0 %150  ;;  %v333_v51 = vunpack.c.l.b16 %v1557_v41  ;;  %v402_v10 = vunpack.c.l.b16 %v1573_v52 }
 0x116   :  { %v241_v43 = vunpack.c.l.b16 %v1559_v42 }
 0x117   :  { %v334_v56 = vpack.c.b16 %v333_v51, %v333_v51  ;;  %v403_v12 = vpack.c.b16 %v402_v10, %v402_v10 }
 0x118   :  { %v242_v44 = vpack.c.b16 %v241_v43, %v241_v43 }
 0x11a   :  { %243 = vrot.lane.b32.xlu0 %v242_v44, %s1475_s27 }
 0x11c   :  { %v1565_v46 = vpop.permute.xlu1 %160  ;;  %v1589_v61 = vpop.permute.xlu2 %174 }
 0x11d   :  { %v1567_v47 = vpop.permute.xlu0 %152  ;;  %v356_v59 = vunpack.c.l.b16 %v1565_v46  ;;  %v517_v2 = vunpack.c.l.b16 %v1589_v61 }
 0x11e   :  { %v264_v48 = vunpack.c.l.b16 %v1567_v47 }
 0x11f   :  { %v357_v1 = vpack.c.b16 %v356_v59, %v356_v59  ;;  %v518_v5 = vpack.c.b16 %v517_v2, %v517_v2  ;;  %v179_v2 = vrot.slane %v1535_v32, 4 }
 0x120   :  { %v265_v49 = vpack.c.b16 %v264_v48, %v264_v48  ;;  %v1266_v48 = vunpack.c.l.bf16 %v1631_v36 }
 0x121   :  { %v811_v4 = vsel %vm790_vm2, %v179_v2, 0 }
 0x122   :  { %176 = vrot.lane.b32.xlu0 %v1535_v32, %s1482_s6  ;;  %266 = vrot.lane.b32.xlu1 %v265_v49, %s1475_s27 }
 0x124   :  { %v221_v50 = vpop.permute.xlu1 %220  ;;  %v1599_v7 = vpop.permute.xlu2 %172 }
 0x125   :  { %v197_v53 = vpop.permute.xlu0 %196  ;;  %v226_v54 = vsel %vm198_vm1, %v221_v50, 0  ;;  %v494_v9 = vunpack.c.l.b16 %v1599_v7 }
 0x126   :  { %v203_v55 = vsel %vm198_vm1, %v197_v53, 0  ;;  %235 = vmatpush.bf16.xpose.msra.mxu3 %v226_v54  ;;  %v180_v53 = vrot.slane %v1559_v42, 4 }
 0x127   :  { %212 = vmatpush.bf16.xpose.msra.mxu2 %v203_v55  ;;  %v495_v11 = vpack.c.b16 %v494_v9, %v494_v9  ;;  %v1280_v9 = vld [vmem:[#allocation7 + $0x8] sm:$0xff]  }
 0x128   :  { %v1270_v10 = vunpack.c.l.bf16 %v1280_v9 }
 0x12a   :  { %335 = vrot.lane.b32.xlu0 %v334_v56, %s1475_s27  ;;  %170 = vrot.lane.b32.xlu1 %v1530_v29, %s1483_s7 }
 0x12c   :  { %v1591_v0 = vpop.permute.xlu1 %162 }
 0x12d   :  { %v1581_v58 = vpop.permute.xlu0 %168  ;;  %1225 = vmatmul.msk.bf16.vlgmr.msra.gmra.mxu3 %vm198_vm1, %v1535_v32  ;;  %v379_v3 = vunpack.c.l.b16 %v1591_v0 }
 0x12e   :  { %1224 = vmatmul.msk.bf16.vlgmr.msra.gmra.mxu2 %vm198_vm1, %v1530_v29  ;;  %v448_v60 = vunpack.c.l.b16 %v1581_v58 }
 0x12f   :  { %v380_v6 = vpack.c.b16 %v379_v3, %v379_v3 }
 0x130   :  { %v449_v63 = vpack.c.b16 %v448_v60, %v448_v60  ;;  %v830_v60 = vsel %vm790_vm2, %v180_v53, 0 }
 0x132   :  { %312 = vrot.lane.b32.xlu0 %v311_v62, %s1475_s27  ;;  %450 = vrot.lane.b32.xlu2 %v449_v63, %s1475_s27 }
 0x133   :  { %358 = vrot.lane.b32.xlu1 %v357_v1, %s1475_s27 }
 0x13a   :  { %519 = vrot.lane.b32.xlu2 %v518_v5, %s1475_s27  ;;  %381 = vrot.lane.b32.xlu0 %v380_v6, %s1475_s27  ;;  %v184_v5 = vrot.slane %v1557_v41, 4  ;;  %v183_v6 = vrot.slane %v1555_v40, 4 }
 0x13b   :  { %427 = vrot.lane.b32.xlu1 %v426_v8, %s1475_s27 }
 0x13c   :  { %v906_v32 = vsel %vm790_vm2, %v184_v5, 0  ;;  %v887_v8 = vsel %vm790_vm2, %v183_v6, 0 }
 0x142   :  { %496 = vrot.lane.b32.xlu2 %v495_v11, %s1475_s27 }
 0x143   :  { %404 = vrot.lane.b32.xlu1 %v403_v12, %s1475_s27 }
 0x15b   :  { %v290_v13 = vpop.permute.xlu2 %289 }
 0x15c   :  { %v295_v14 = vsel %vm198_vm1, %v290_v13, 0 }
 0x15d   :  { %304 = vmatpush.bf16.xpose.msrb.mxu0 %v295_v14  ;;  %v181_v14 = vrot.slane %v1567_v47, 4 }
 0x164   :  { %1228 = vmatmul.msk.bf16.vlgmr.msrb.gmra.mxu0 %vm198_vm1, %v1551_v37 }
 0x18c   :  { %v244_v15 = vpop.permute.xlu0 %243  ;;  %v451_v26 = vpop.permute.xlu2 %450 }
 0x18d   :  { %v249_v16 = vsel %vm198_vm1, %v244_v15, 0  ;;  %v456_v34 = vsel %vm198_vm1, %v451_v26, 0 }
 0x18e   :  { %258 = vmatpush.bf16.xpose.msrb.mxu2 %v249_v16  ;;  %v849_v16 = vsel %vm790_vm2, %v181_v14, 0 }
 0x194   :  { %v1612_v17 = vpop.permute.xlu0 %176  ;;  %v267_v18 = vpop.permute.xlu1 %266 }
 0x195   :  { %1226 = vmatmul.msk.bf16.vlgmr.msrb.gmra.mxu2 %vm198_vm1, %v1559_v42  ;;  %v540_v19 = vunpack.c.l.b16 %v1612_v17  ;;  %v272_v20 = vsel %vm198_vm1, %v267_v18, 0  ;;  %v520_v35 = vpop.permute.xlu2 %519  ;;  %v185_v18 = vrot.slane %v1565_v46, 4 }
 0x196   :  { %281 = vmatpush.bf16.xpose.msrb.mxu3 %v272_v20  ;;  %v525_v49 = vsel %vm198_vm1, %v520_v35, 0 }
 0x197   :  { %v541_v21 = vpack.c.b16 %v540_v19, %v540_v19  ;;  %v178_v19 = vrot.slane %v1530_v29, 4 }
 0x199   :  { %542 = vrot.lane.b32.xlu0 %v541_v21, %s1475_s27  ;;  %v925_v21 = vsel %vm790_vm2, %v185_v18, 0 }
 0x19c   :  { %v336_v22 = vpop.permute.xlu0 %335  ;;  %v1620_v24 = vpop.permute.xlu1 %170 }
 0x19d   :  { %v341_v23 = vsel %vm198_vm1, %v336_v22, 0  ;;  %1227 = vmatmul.msk.bf16.vlgmr.msrb.gmra.mxu3 %vm198_vm1, %v1567_v47  ;;  %v471_v25 = vunpack.c.l.b16 %v1620_v24  ;;  %v497_v55 = vpop.permute.xlu2 %496  ;;  %v1267_v47 = vunpack.c.h.bf16 %v1631_v36 }
 0x19e   :  { %350 = vmatpush.bf16.xpose.msra.mxu2 %v341_v23  ;;  %v502_v42 = vsel %vm198_vm1, %v497_v55, 0  ;;  %v792_v23 = vsel %vm790_vm2, %v178_v19, 0 }
 0x19f   :  { %v472_v27 = vpack.c.b16 %v471_v25, %v471_v25 }
 0x1a1   :  { %473 = vrot.lane.b32.xlu1 %v472_v27, %s1475_s27 }
 0x1a4   :  { %v313_v28 = vpop.permute.xlu0 %312 }
 0x1a5   :  { %v359_v30 = vpop.permute.xlu1 %358  ;;  %1230 = vmatmul.msk.bf16.vlgmr.msra.gmra.mxu2 %vm198_vm1, %v1557_v41  ;;  %v318_v31 = vsel %vm198_vm1, %v313_v28, 0 }
 0x1a6   :  { %v364_v33 = vsel %vm198_vm1, %v359_v30, 0  ;;  %327 = vmatpush.bf16.xpose.msrb.mxu1 %v318_v31 }
 0x1a7   :  { %373 = vmatpush.bf16.xpose.msra.mxu3 %v364_v33 }
 0x1ac   :  { %v382_v38 = vpop.permute.xlu0 %381 }
 0x1ad   :  { %v387_v39 = vsel %vm198_vm1, %v382_v38, 0  ;;  %v428_v43 = vpop.permute.xlu1 %427  ;;  %1229 = vmatmul.msk.bf16.vlgmr.msrb.gmra.mxu1 %vm198_vm1, %v1555_v40 }
 0x1ae   :  { %v433_v44 = vsel %vm198_vm1, %v428_v43, 0  ;;  %1231 = vmatmul.msk.bf16.vlgmr.msra.gmra.mxu3 %vm198_vm1, %v1565_v46  ;;  %396 = vmatpush.bf16.xpose.msra.mxu0 %v387_v39  ;;  %v182_v46 = vrot.slane %v1551_v37, 4  ;;  %v1271_v37 = vunpack.c.h.bf16 %v1280_v9 }
 0x1af   :  { %465 = vmatpush.bf16.xpose.msrb.mxu3 %v456_v34  ;;  %442 = vmatpush.bf16.xpose.msrb.mxu2 %v433_v44 }
 0x1b0   :  { %v237_v50 = vpop.f32.mrf.mxu3  ;;  %v868_v27 = vsel %vm790_vm2, %v182_v46, 0 }
 0x1b1   :  { %v214_v51 = vpop.f32.mrf.mxu2  ;;  %v1653_v62 = vadd.f32 %v1266_v48, %v237_v50 }
 0x1b2   :  { %v1642_v54 = vadd.f32 %v1266_v48, %v214_v51  ;;  %v1281_v48 = vld [vmem:[#allocation7 + $0x10] sm:$0xff]  }
 0x1b3   :  { %v598_v3 = vsel %vm198_vm1, %v1653_v62, -inf  ;;  %v1274_v55 = vunpack.c.l.bf16 %v1281_v48 }
 0x1b4   :  { %v595_v56 = vsel %vm198_vm1, %v1642_v54, -inf }
 0x1b5   :  { %v405_v57 = vpop.permute.xlu1 %404  ;;  %596 = vmax.xlane.f32.xlu2 %v595_v56  ;;  %1232 = vmatmul.msk.bf16.vlgmr.msra.gmra.mxu0 %vm198_vm1, %v1591_v0 }
 0x1b6   :  { %v410_v59 = vsel %vm198_vm1, %v405_v57, 0  ;;  %1234 = vmatmul.msk.bf16.vlgmr.msrb.gmra.mxu2 %vm198_vm1, %v1563_v45 }
 0x1b7   :  { %534 = vmatpush.bf16.xpose.msra.mxu2 %v525_v49  ;;  %419 = vmatpush.bf16.xpose.msra.mxu1 %v410_v59  ;;  %v1275_v59 = vunpack.c.h.bf16 %v1281_v48 }
 0x1b8   :  { %v239_v63 = vpop.f32.mrf.mxu3 }
 0x1b9   :  { %v216_v1 = vpop.f32.mrf.mxu2 }
 0x1bd   :  { %599 = vmax.xlane.f32.xlu2 %v598_v3 }
 0x1be   :  { %1233 = vmatmul.msk.bf16.vlgmr.msra.gmra.mxu1 %vm198_vm1, %v1573_v52  ;;  %1235 = vmatmul.msk.bf16.vlgmr.msrb.gmra.mxu3 %vm198_vm1, %v1581_v58 }
 0x1bf   :  { %839 = vmatpush.bf16.msrb.mxu2 %v830_v60  ;;  %511 = vmatpush.bf16.xpose.msrb.mxu1 %v502_v42 }
 0x1c6   :  { %1238 = vmatmul.msk.bf16.vlgmr.msra.gmra.mxu2 %vm198_vm1, %v1589_v61 }
 0x1c7   :  { %820 = vmatpush.bf16.msra.mxu1 %v811_v4  ;;  %915 = vmatpush.bf16.msra.mxu2 %v906_v32 }
 0x1ce   :  { %1237 = vmatmul.msk.bf16.vlgmr.msrb.gmra.mxu1 %vm198_vm1, %v1599_v7 }
 0x1cf   :  { %896 = vmatpush.bf16.msrb.mxu1 %v887_v8 }
 0x1e1   :  { %v306_v11 = vpop.f32.mrf.mxu0 }
 0x1e2   :  { %v1671_v12 = vadd.f32 %v1270_v10, %v306_v11  ;;  %v1282_v11 = vld [vmem:[#allocation7 + $0x18] sm:$0xff]  }
 0x1e3   :  { %v1279_v14 = vunpack.c.h.bf16 %v1282_v11 }
 0x1e4   :  { %v607_v41 = vsel %vm198_vm1, %v1671_v12, -inf }
 0x1e5   :  { %608 = vmax.xlane.f32.xlu2 %v607_v41 }
 0x1e9   :  { %v308_v13 = vpop.f32.mrf.mxu0 }
 0x20b   :  { %v543_v15 = vpop.permute.xlu0 %542 }
 0x20c   :  { %v548_v40 = vsel %vm198_vm1, %v543_v15, 0  ;;  %v1278_v15 = vunpack.c.l.bf16 %v1282_v11 }
 0x20d   :  { %557 = vmatpush.bf16.xpose.msra.mxu3 %v548_v40 }
 0x213   :  { %v474_v20 = vpop.permute.xlu1 %473 }
 0x214   :  { %1239 = vmatmul.msk.bf16.vlgmr.msra.gmra.mxu3 %vm198_vm1, %v1612_v17  ;;  %v479_v22 = vsel %vm198_vm1, %v474_v20, 0 }
 0x215   :  { %858 = vmatpush.bf16.msrb.mxu3 %v849_v16  ;;  %488 = vmatpush.bf16.xpose.msrb.mxu0 %v479_v22 }
 0x218   :  { %v260_v25 = vpop.f32.mrf.mxu2 }
 0x219   :  { %934 = vmatpush.bf16.msra.mxu3 %v925_v21  ;;  %v1687_v26 = vadd.f32 %v1267_v47, %v260_v25 }
 0x21b   :  { %v601_v29 = vsel %vm198_vm1, %v1687_v26, -inf }
 0x21c   :  { %602 = vmax.xlane.f32.xlu0 %v601_v29  ;;  %1236 = vmatmul.msk.bf16.vlgmr.msrb.gmra.mxu0 %vm198_vm1, %v1620_v24 }
 0x21d   :  { %801 = vmatpush.bf16.msra.mxu0 %v792_v23 }
 0x220   :  { %v262_v28 = vpop.f32.mrf.mxu2  ;;  %v283_v30 = vpop.f32.mrf.mxu3 }
 0x221   :  { %877 = vmatpush.bf16.msrb.mxu0 %v868_v27  ;;  %v1694_v31 = vadd.f32 %v1267_v47, %v283_v30 }
 0x223   :  { %v604_v33 = vsel %vm198_vm1, %v1694_v31, -inf }
 0x224   :  { %605 = vmax.xlane.f32.xlu1 %v604_v33 }
 0x228   :  { %v352_v34 = vpop.f32.mrf.mxu2  ;;  %v285_v35 = vpop.f32.mrf.mxu3 }
 0x229   :  { %v1698_v36 = vadd.f32 %v1271_v37, %v352_v34  ;;  %v597_v23 = vpop.xlane.xlu2 %596 }
 0x22a   :  { %v329_v38 = vpop.f32.mrf.mxu1 }
 0x22b   :  { %v613_v39 = vsel %vm198_vm1, %v1698_v36, -inf  ;;  %v1702_v43 = vadd.f32 %v1270_v10, %v329_v38 }
 0x22c   :  { %614 = vmax.xlane.f32.xlu0 %v613_v39 }
 0x22d   :  { %v610_v56 = vsel %vm198_vm1, %v1702_v43, -inf }
 0x230   :  { %v354_v44 = vpop.f32.mrf.mxu2 }
 0x231   :  { %v375_v49 = vpop.f32.mrf.mxu3  ;;  %v600_v27 = vpop.xlane.xlu2 %599  ;;  %v643_v44 = vsub.f32 %v1642_v54, %v597_v23 }
 0x232   :  { %v1704_v50 = vadd.f32 %v1271_v37, %v375_v49  ;;  %v331_v51 = vpop.f32.mrf.mxu1  ;;  %v398_v53 = vpop.f32.mrf.mxu0  ;;  %v644_v37 = vsub.f32 %v1653_v62, %v600_v27 }
 0x233   :  { %v1710_v60 = vadd.f32 %v1274_v55, %v398_v53 }
 0x234   :  { %611 = vmax.xlane.f32.xlu0 %v610_v56  ;;  %v616_v57 = vsel %vm198_vm1, %v1704_v50, -inf  ;;  %v661_v49 = vmul.f32 1.442695, %v644_v37 }
 0x235   :  { %617 = vmax.xlane.f32.xlu1 %v616_v57  ;;  %v619_v4 = vsel %vm198_vm1, %v1710_v60, -inf }
 0x239   :  { %v377_v42 = vpop.f32.mrf.mxu3  ;;  %v444_v63 = vpop.f32.mrf.mxu2 }
 0x23a   :  { %v1712_v1 = vadd.f32 %v1275_v59, %v444_v63  ;;  %v400_v2 = vpop.f32.mrf.mxu0 }
 0x23b   :  { %v421_v3 = vpop.f32.mrf.mxu1 }
 0x23c   :  { %620 = vmax.xlane.f32.xlu0 %v619_v4  ;;  %v625_v5 = vsel %vm198_vm1, %v1712_v1, -inf  ;;  %v1718_v32 = vadd.f32 %v1274_v55, %v421_v3 }
 0x23d   :  { %626 = vmax.xlane.f32.xlu1 %v625_v5 }
 0x23e   :  { %v622_v13 = vsel %vm198_vm1, %v1718_v32, -inf }
 0x241   :  { %v446_v6 = vpop.f32.mrf.mxu2  ;;  %v467_v8 = vpop.f32.mrf.mxu3 }
 0x242   :  { %v1720_v9 = vadd.f32 %v1275_v59, %v467_v8 }
 0x243   :  { %v423_v10 = vpop.f32.mrf.mxu1 }
 0x244   :  { %v628_v41 = vsel %vm198_vm1, %v1720_v9, -inf }
 0x245   :  { %629 = vmax.xlane.f32.xlu2 %v628_v41  ;;  %623 = vmax.xlane.f32.xlu1 %v622_v13 }
 0x249   :  { %v469_v40 = vpop.f32.mrf.mxu3  ;;  %v536_v16 = vpop.f32.mrf.mxu2 }
 0x24a   :  { %v1726_v18 = vadd.f32 %v1279_v14, %v536_v16 }
 0x24b   :  { %v513_v19 = vpop.f32.mrf.mxu1 }
 0x24c   :  { %v1728_v20 = vadd.f32 %v1278_v15, %v513_v19  ;;  %v637_v21 = vsel %vm198_vm1, %v1726_v18, -inf }
 0x24d   :  { %638 = vmax.xlane.f32.xlu2 %v637_v21 }
 0x24e   :  { %v634_v2 = vsel %vm198_vm1, %v1728_v20, -inf }
 0x251   :  { %v538_v22 = vpop.f32.mrf.mxu2 }
 0x253   :  { %v515_v47 = vpop.f32.mrf.mxu1 }
 0x258   :  { %v609_v51 = vpop.xlane.xlu2 %608 }
 0x259   :  { %v647_v57 = vsub.f32 %v1671_v12, %v609_v51 }
 0x25b   :  { %v667_v3 = vmul.f32 1.442695, %v647_v57 }
 0x28f   :  { %v603_v25 = vpop.xlane.xlu0 %602 }
 0x290   :  { %v645_v46 = vsub.f32 %v1687_v26, %v603_v25 }
 0x292   :  { %v663_v29 = vmul.f32 1.442695, %v645_v46 }
 0x294   :  { %1304 = vpow2.f32 %v663_v29 }
 0x297   :  { %v559_v28 = vpop.f32.mrf.mxu3  ;;  %v606_v33 = vpop.xlane.xlu1 %605 }
 0x298   :  { %v1733_v30 = vadd.f32 %v1279_v14, %v559_v28  ;;  %v646_v34 = vsub.f32 %v1694_v31, %v606_v33  ;;  %v659_v31 = vmul.f32 1.442695, %v643_v44 }
 0x299   :  { %v490_v38 = vpop.f32.mrf.mxu0 }
 0x29a   :  { %v1737_v35 = vpop.eup %1304  ;;  %v640_v39 = vsel %vm198_vm1, %v1733_v30, -inf  ;;  %v665_v26 = vmul.f32 1.442695, %v646_v34  ;;  %v1744_v62 = vadd.f32 %v1278_v15, %v490_v38 }
 0x29b   :  { %641 = vmax.xlane.f32.xlu0 %v640_v39  ;;  %v697_v48 = vsel %vm198_vm1, %v1737_v35, 0.0 }
 0x29c   :  { %698 = vadd.xlane.f32.xlu1 %v697_v48  ;;  %1306 = vpow2.f32 %v665_v26  ;;  %v631_v42 = vsel %vm198_vm1, %v1744_v62, -inf }
 0x29d   :  { %1308 = vpow2.f32 %v661_v49 }
 0x29e   :  { %1310 = vpow2.f32 %v659_v31 }
 0x29f   :  { %v615_v53 = vpop.xlane.xlu0 %614  ;;  %v561_v55 = vpop.f32.mrf.mxu3 }
 0x2a0   :  { %v649_v56 = vsub.f32 %v1698_v36, %v615_v53 }
 0x2a1   :  { %v492_v59 = vpop.f32.mrf.mxu0 }
 0x2a2   :  { %v671_v54 = vmul.f32 1.442695, %v649_v56  ;;  %v1750_v63 = vpop.eup %1306 }
 0x2a3   :  { %632 = vmax.xlane.f32.xlu0 %v631_v42  ;;  %v700_v36 = vsel %vm198_vm1, %v1750_v63, 0.0  ;;  %v1756_v12 = vpop.eup %1308 }
 0x2a4   :  { %1312 = vpow2.f32 %v671_v54  ;;  %635 = vmax.xlane.f32.xlu1 %v634_v2  ;;  %701 = vadd.xlane.f32.xlu2 %v700_v36  ;;  %v1759_v8 = vpop.eup %1310  ;;  %v694_v13 = vsel %vm198_vm1, %v1756_v12, 0.0  ;;  %v188_v36 = vrot.slane %v1563_v45, 4 }
 0x2a5   :  { %1314 = vpow2.f32 %v667_v3 }
 0x2a6   :  { %v982_v45 = vsel %vm790_vm2, %v188_v36, 0 }
 0x2a7   :  { %v612_v4 = vpop.xlane.xlu0 %611 }
 0x2a8   :  { %v648_v5 = vsub.f32 %v1702_v43, %v612_v4  ;;  %v618_v6 = vpop.xlane.xlu1 %617  ;;  %v691_v43 = vsel %vm198_vm1, %v1759_v8, 0.0 }
 0x2a9   :  { %v650_v10 = vsub.f32 %v1704_v50, %v618_v6 }
 0x2aa   :  { %v1762_v11 = vpop.eup %1312  ;;  %v669_v41 = vmul.f32 1.442695, %v648_v5 }
 0x2ab   :  { %v673_v14 = vmul.f32 1.442695, %v650_v10  ;;  %695 = vadd.xlane.f32.xlu0 %v694_v13  ;;  %v709_v15 = vsel %vm198_vm1, %v1762_v11, 0.0  ;;  %v1770_v40 = vpop.eup %1314 }
 0x2ac   :  { %1316 = vpow2.f32 %v669_v41  ;;  %710 = vadd.xlane.f32.xlu1 %v709_v15  ;;  %692 = vadd.xlane.f32.xlu2 %v691_v43  ;;  %v703_v23 = vsel %vm198_vm1, %v1770_v40, 0.0  ;;  %v189_v43 = vrot.slane %v1581_v58, 4 }
 0x2ad   :  { %1318 = vpow2.f32 %v673_v14 }
 0x2ae   :  { %v1001_v58 = vsel %vm790_vm2, %v189_v43, 0 }
 0x2af   :  { %v621_v50 = vpop.xlane.xlu0 %620 }
 0x2b0   :  { %v651_v16 = vsub.f32 %v1710_v60, %v621_v50  ;;  %v627_v19 = vpop.xlane.xlu1 %626 }
 0x2b1   :  { %v653_v21 = vsub.f32 %v1712_v1, %v627_v19 }
 0x2b2   :  { %v1774_v22 = vpop.eup %1316  ;;  %v675_v47 = vmul.f32 1.442695, %v651_v16 }
 0x2b3   :  { %v1778_v25 = vpop.eup %1318  ;;  %v679_v46 = vmul.f32 1.442695, %v653_v21  ;;  %704 = vadd.xlane.f32.xlu0 %v703_v23  ;;  %v706_v29 = vsel %vm198_vm1, %v1774_v22, 0.0 }
 0x2b4   :  { %1320 = vpow2.f32 %v675_v47  ;;  %707 = vadd.xlane.f32.xlu1 %v706_v29  ;;  %v712_v60 = vsel %vm198_vm1, %v1778_v25, 0.0 }
 0x2b5   :  { %1322 = vpow2.f32 %v679_v46  ;;  %713 = vadd.xlane.f32.xlu2 %v712_v60  ;;  %v187_v60 = vrot.slane %v1573_v52, 4 }
 0x2b7   :  { %v963_v52 = vsel %vm790_vm2, %v187_v60, 0 }
 0x2b8   :  { %v630_v1 = vpop.xlane.xlu2 %629  ;;  %v624_v27 = vpop.xlane.xlu1 %623 }
 0x2b9   :  { %v654_v28 = vsub.f32 %v1720_v9, %v630_v1  ;;  %v652_v33 = vsub.f32 %v1718_v32, %v624_v27 }
 0x2ba   :  { %v1786_v37 = vpop.eup %1320 }
 0x2bb   :  { %v1788_v34 = vpop.eup %1322  ;;  %v681_v38 = vmul.f32 1.442695, %v654_v28  ;;  %v677_v39 = vmul.f32 1.442695, %v652_v33  ;;  %v715_v44 = vsel %vm198_vm1, %v1786_v37, 0.0  ;;  %v192_v28 = vrot.slane %v1589_v61, 4 }
 0x2bc   :  { %716 = vadd.xlane.f32.xlu1 %v715_v44  ;;  %v721_v26 = vsel %vm198_vm1, %v1788_v34, 0.0 }
 0x2bd   :  { %1324 = vpow2.f32 %v681_v38  ;;  %722 = vadd.xlane.f32.xlu2 %v721_v26  ;;  %v186_v38 = vrot.slane %v1591_v0, 4  ;;  %v1058_v61 = vsel %vm790_vm2, %v192_v28, 0 }
 0x2be   :  { %1326 = vpow2.f32 %v677_v39 }
 0x2bf   :  { %v944_v0 = vsel %vm790_vm2, %v186_v38, 0 }
 0x2c0   :  { %v639_v48 = vpop.xlane.xlu2 %638 }
 0x2c1   :  { %v657_v9 = vsub.f32 %v1726_v18, %v639_v48 }
 0x2c3   :  { %v1795_v32 = vpop.eup %1324  ;;  %v687_v49 = vmul.f32 1.442695, %v657_v9 }
 0x2c4   :  { %v1797_v51 = vpop.eup %1326  ;;  %v724_v31 = vsel %vm198_vm1, %v1795_v32, 0.0 }
 0x2c5   :  { %1328 = vpow2.f32 %v687_v49  ;;  %725 = vadd.xlane.f32.xlu0 %v724_v31  ;;  %v718_v53 = vsel %vm198_vm1, %v1797_v51, 0.0 }
 0x2c6   :  { %719 = vadd.xlane.f32.xlu2 %v718_v53 }
 0x2cb   :  { %v1803_v55 = vpop.eup %1328 }
 0x2cc   :  { %v733_v56 = vsel %vm198_vm1, %v1803_v55, 0.0 }
 0x2cd   :  { %734 = vadd.xlane.f32.xlu0 %v733_v56 }
 0x30e   :  { %v642_v18 = vpop.xlane.xlu0 %641 }
 0x30f   :  { %v658_v57 = vsub.f32 %v1733_v30, %v642_v18  ;;  %v699_v54 = vpop.xlane.xlu1 %698 }
 0x310   :  { %1330 = vrcp.f32 %v699_v54 }
 0x311   :  { %v689_v59 = vmul.f32 1.442695, %v658_v57 }
 0x313   :  { %1332 = vpow2.f32 %v689_v59 }
 0x316   :  { %v1331_v42 = vpop.eup %1330  ;;  %v633_v2 = vpop.xlane.xlu0 %632 }
 0x317   :  { %v757_v3 = vmul.f32 %v1331_v42, %v1737_v35  ;;  %v655_v4 = vsub.f32 %v1744_v62, %v633_v2  ;;  %v636_v5 = vpop.xlane.xlu1 %635  ;;  %v702_v6 = vpop.xlane.xlu2 %701  ;;  %v191_v42 = vrot.slane %v1599_v7, 4 }
 0x318   :  { %v656_v10 = vsub.f32 %v1728_v20, %v636_v5  ;;  %1334 = vrcp.f32 %v702_v6 }
 0x319   :  { %v1812_v41 = vpop.eup %1332  ;;  %v773_v13 = vpack.c.bf16 %v757_v3, %v757_v3  ;;  %v683_v30 = vmul.f32 1.442695, %v655_v4 }
 0x31a   :  { %v685_v14 = vmul.f32 1.442695, %v656_v10  ;;  %v736_v15 = vsel %vm198_vm1, %v1812_v41, 0.0 }
 0x31b   :  { %1336 = vpow2.f32 %v683_v30  ;;  %737 = vadd.xlane.f32.xlu1 %v736_v15  ;;  %1242 = vmatmul.msk.bf16.vlgmr.msrb.gmra.mxu2 %vm198_vm1, %v773_v13  ;;  %v1039_v13 = vsel %vm790_vm2, %v191_v42, 0 }
 0x31c   :  { %1338 = vpow2.f32 %v685_v14  ;;  %991 = vmatpush.bf16.msrb.mxu2 %v982_v45 }
 0x31e   :  { %v696_v35 = vpop.xlane.xlu0 %695  ;;  %v1335_v62 = vpop.eup %1334 }
 0x31f   :  { %1340 = vrcp.f32 %v696_v35  ;;  %v711_v20 = vpop.xlane.xlu1 %710  ;;  %v758_v50 = vmul.f32 %v1335_v62, %v1750_v63  ;;  %v693_v16 = vpop.xlane.xlu2 %692 }
 0x320   :  { %1342 = vrcp.f32 %v711_v20 }
 0x321   :  { %v1820_v19 = vpop.eup %1336  ;;  %1344 = vrcp.f32 %v693_v16  ;;  %v774_v47 = vpack.c.bf16 %v758_v50, %v758_v50 }
 0x322   :  { %v1822_v21 = vpop.eup %1338  ;;  %v727_v23 = vsel %vm198_vm1, %v1820_v19, 0.0 }
 0x323   :  { %728 = vadd.xlane.f32.xlu2 %v727_v23  ;;  %v730_v46 = vsel %vm198_vm1, %v1822_v21, 0.0  ;;  %1243 = vmatmul.msk.bf16.vlgmr.msrb.gmra.mxu3 %vm198_vm1, %v774_v47 }
 0x324   :  { %731 = vadd.xlane.f32.xlu0 %v730_v46  ;;  %1010 = vmatpush.bf16.msrb.mxu3 %v1001_v58 }
 0x325   :  { %v1341_v63 = vpop.eup %1340 }
 0x326   :  { %v1343_v29 = vpop.eup %1342  ;;  %v756_v1 = vmul.f32 %v1341_v63, %v1756_v12  ;;  %v705_v31 = vpop.xlane.xlu0 %704 }
 0x327   :  { %v1345_v27 = vpop.eup %1344  ;;  %v761_v33 = vmul.f32 %v1343_v29, %v1762_v11  ;;  %v708_v48 = vpop.xlane.xlu1 %707 }
 0x328   :  { %v772_v39 = vpack.c.bf16 %v756_v1, %v756_v1  ;;  %v755_v44 = vmul.f32 %v1345_v27, %v1759_v8  ;;  %v714_v26 = vpop.xlane.xlu2 %713  ;;  %v193_v8 = vrot.slane %v1612_v17, 4  ;;  %v190_v17 = vrot.slane %v1620_v24, 4 }
 0x329   :  { %v777_v9 = vpack.c.bf16 %v761_v33, %v761_v33  ;;  %1346 = vrcp.f32 %v714_v26 }
 0x32a   :  { %v771_v49 = vpack.c.bf16 %v755_v44, %v755_v44  ;;  %1241 = vmatmul.msk.bf16.vlgmr.msra.gmra.mxu1 %vm198_vm1, %v772_v39  ;;  %1348 = vrcp.f32 %v708_v48  ;;  %v1077_v59 = vsel %vm790_vm2, %v193_v8, 0  ;;  %v1020_v7 = vsel %vm790_vm2, %v190_v17, 0 }
 0x32b   :  { %972 = vmatpush.bf16.msra.mxu1 %v963_v52  ;;  %1246 = vmatmul.msk.bf16.vlgmr.msra.gmra.mxu2 %vm198_vm1, %v777_v9  ;;  %1350 = vrcp.f32 %v705_v31 }
 0x32c   :  { %1240 = vmatmul.msk.bf16.vlgmr.msra.gmra.mxu0 %vm198_vm1, %v771_v49  ;;  %1067 = vmatpush.bf16.msra.mxu2 %v1058_v61 }
 0x32d   :  { %953 = vmatpush.bf16.msra.mxu0 %v944_v0 }
 0x32f   :  { %v1347_v12 = vpop.eup %1346  ;;  %v717_v10 = vpop.xlane.xlu1 %716 }
 0x330   :  { %v762_v11 = vmul.f32 %v1347_v12, %v1778_v25  ;;  %v723_v53 = vpop.xlane.xlu2 %722  ;;  %v1349_v56 = vpop.eup %1348 }
 0x331   :  { %1352 = vrcp.f32 %v723_v53  ;;  %v1351_v57 = vpop.eup %1350  ;;  %v760_v54 = vmul.f32 %v1349_v56, %v1774_v22 }
 0x332   :  { %v778_v18 = vpack.c.bf16 %v762_v11, %v762_v11  ;;  %v759_v2 = vmul.f32 %v1351_v57, %v1770_v40 }
 0x333   :  { %v776_v25 = vpack.c.bf16 %v760_v54, %v760_v54 }
 0x334   :  { %1247 = vmatmul.msk.bf16.vlgmr.msra.gmra.mxu3 %vm198_vm1, %v778_v18  ;;  %v775_v6 = vpack.c.bf16 %v759_v2, %v759_v2 }
 0x335   :  { %1086 = vmatpush.bf16.msra.mxu3 %v1077_v59 }
 0x337   :  { %v1353_v36 = vpop.eup %1352 }
 0x338   :  { %v765_v3 = vmul.f32 %v1353_v36, %v1788_v34  ;;  %v726_v4 = vpop.xlane.xlu0 %725 }
 0x339   :  { %1354 = vrcp.f32 %v726_v4  ;;  %v720_v5 = vpop.xlane.xlu2 %719 }
 0x33a   :  { %v781_v22 = vpack.c.bf16 %v765_v3, %v765_v3  ;;  %1245 = vmatmul.msk.bf16.vlgmr.msrb.gmra.mxu1 %vm198_vm1, %v776_v25  ;;  %1356 = vrcp.f32 %v720_v5 }
 0x33b   :  { %1048 = vmatpush.bf16.msrb.mxu1 %v1039_v13  ;;  %1358 = vrcp.f32 %v717_v10 }
 0x33c   :  { %1244 = vmatmul.msk.bf16.vlgmr.msrb.gmra.mxu0 %vm198_vm1, %v775_v6  ;;  %1250 = vmatmul.msk.bf16.vlgmr.msrb.gmra.mxu2 %vm198_vm1, %v781_v22 }
 0x33d   :  { %1029 = vmatpush.bf16.msrb.mxu0 %v1020_v7 }
 0x33f   :  { %v1355_v24 = vpop.eup %1354 }
 0x340   :  { %v766_v40 = vmul.f32 %v1355_v24, %v1795_v32  ;;  %v735_v34 = vpop.xlane.xlu0 %734  ;;  %v1357_v30 = vpop.eup %1356 }
 0x341   :  { %1360 = vrcp.f32 %v735_v34  ;;  %v1359_v15 = vpop.eup %1358  ;;  %v764_v45 = vmul.f32 %v1357_v30, %v1797_v51 }
 0x342   :  { %v782_v14 = vpack.c.bf16 %v766_v40, %v766_v40  ;;  %v763_v35 = vmul.f32 %v1359_v15, %v1786_v37 }
 0x343   :  { %v780_v20 = vpack.c.bf16 %v764_v45, %v764_v45 }
 0x344   :  { %1251 = vmatmul.msk.bf16.vlgmr.msrb.gmra.mxu3 %vm198_vm1, %v782_v14  ;;  %v779_v50 = vpack.c.bf16 %v763_v35, %v763_v35 }
 0x347   :  { %v1361_v62 = vpop.eup %1360 }
 0x348   :  { %v769_v43 = vmul.f32 %v1361_v62, %v1803_v55 }
 0x34a   :  { %v785_v16 = vpack.c.bf16 %v769_v43, %v769_v43  ;;  %1249 = vmatmul.msk.bf16.vlgmr.msra.gmra.mxu1 %vm198_vm1, %v780_v20 }
 0x34c   :  { %1248 = vmatmul.msk.bf16.vlgmr.msra.gmra.mxu0 %vm198_vm1, %v779_v50  ;;  %1254 = vmatmul.msk.bf16.vlgmr.msra.gmra.mxu2 %vm198_vm1, %v785_v16 }
 0x38e   :  { %v738_v32 = vpop.xlane.xlu1 %737 }
 0x38f   :  { %1362 = vrcp.f32 %v738_v32 }
 0x395   :  { %v1363_v47 = vpop.eup %1362 }
 0x396   :  { %v770_v51 = vmul.f32 %v1363_v47, %v1812_v41  ;;  %v729_v23 = vpop.xlane.xlu2 %728 }
 0x397   :  { %1364 = vrcp.f32 %v729_v23  ;;  %v732_v37 = vpop.xlane.xlu0 %731 }
 0x398   :  { %v786_v46 = vpack.c.bf16 %v770_v51, %v770_v51  ;;  %1366 = vrcp.f32 %v732_v37 }
 0x39a   :  { %1255 = vmatmul.msk.bf16.vlgmr.msra.gmra.mxu3 %vm198_vm1, %v786_v46 }
 0x39d   :  { %v1365_v55 = vpop.eup %1364 }
 0x39e   :  { %v1367_v58 = vpop.eup %1366  ;;  %v767_v63 = vmul.f32 %v1365_v55, %v1820_v19  ;;  %v841_v29 = vpop.f32.mrf.mxu2 }
 0x39f   :  { %v768_v60 = vmul.f32 %v1367_v58, %v1822_v21 }
 0x3a0   :  { %v783_v1 = vpack.c.bf16 %v767_v63, %v767_v63 }
 0x3a1   :  { %v784_v27 = vpack.c.bf16 %v768_v60, %v768_v60 }
 0x3a2   :  { %1252 = vmatmul.msk.bf16.vlgmr.msrb.gmra.mxu0 %vm198_vm1, %v783_v1 }
 0x3a3   :  { %1253 = vmatmul.msk.bf16.vlgmr.msrb.gmra.mxu1 %vm198_vm1, %v784_v27 }
 0x3a6   :  { %v843_v41 = vpop.f32.mrf.mxu2  ;;  %v860_v28 = vpop.f32.mrf.mxu3 }
 0x3a7   :  { %v1870_v33 = vpop.f32.mrf.mxu1  ;;  %1096 = vrot.lane.b32.xlu2 %v860_v28, %s1472_s21 }
 0x3a9   :  { %v803_v38 = vpop.f32.mrf.mxu0 }
 0x3ae   :  { %v917_v39 = vpop.f32.mrf.mxu2  ;;  %v862_v44 = vpop.f32.mrf.mxu3 }
 0x3af   :  { %v824_v26 = vpop.f32.mrf.mxu1 }
 0x3b1   :  { %v805_v19 = vpop.f32.mrf.mxu0 }
 0x3b6   :  { %v919_v48 = vpop.f32.mrf.mxu2 }
 0x3b7   :  { %v936_v9 = vpop.f32.mrf.mxu3  ;;  %v898_v21 = vpop.f32.mrf.mxu1 }
 0x3b8   :  { %1112 = vrot.lane.b32.xlu2 %v936_v9, %s1484_s8  ;;  %1104 = vrot.lane.b32.xlu1 %v898_v21, %s1485_s9 }
 0x3b9   :  { %v879_v49 = vpop.f32.mrf.mxu0 }
 0x3ba   :  { %1102 = vrot.lane.b32.xlu0 %v879_v49, %s1485_s9 }
 0x3bf   :  { %v938_v31 = vpop.f32.mrf.mxu3  ;;  %v993_v52 = vpop.f32.mrf.mxu2 }
 0x3c0   :  { %1126 = vrot.lane.b32.xlu2 %v993_v52, %s1486_s10  ;;  %v900_v61 = vpop.f32.mrf.mxu1  ;;  %1094 = vrot.lane.b32.xlu1 %v841_v29, %s1472_s21 }
 0x3c1   :  { %v881_v0 = vpop.f32.mrf.mxu0 }
 0x3c7   :  { %v995_v12 = vpop.f32.mrf.mxu2  ;;  %v1012_v8 = vpop.f32.mrf.mxu3 }
 0x3c8   :  { %v974_v11 = vpop.f32.mrf.mxu1 }
 0x3c9   :  { %v955_v53 = vpop.f32.mrf.mxu0  ;;  %1120 = vrot.lane.b32.xlu0 %v974_v11, %s1487_s11 }
 0x3ca   :  { %1118 = vrot.lane.b32.xlu1 %v955_v53, %s1487_s11 }
 0x3cf   :  { %v1014_v56 = vpop.f32.mrf.mxu3  ;;  %v1069_v18 = vpop.f32.mrf.mxu2 }
 0x3d0   :  { %v976_v57 = vpop.f32.mrf.mxu1 }
 0x3d1   :  { %v957_v54 = vpop.f32.mrf.mxu0  ;;  %1110 = vrot.lane.b32.xlu0 %v917_v39, %s1484_s8 }
 0x3d2   :  { %1128 = vrot.lane.b32.xlu1 %v1012_v8, %s1486_s10 }
 0x3d7   :  { %v1071_v59 = vpop.f32.mrf.mxu2 }
 0x3da   :  { %1142 = vrot.lane.b32.xlu1 %v1069_v18, %s1488_s12 }
 0x401   :  { %v1097_v22 = vpop.permute.xlu2 %1096 }
 0x402   :  { %v1149_v20 = vsel %vm198_vm1, %v1870_v33, %v1097_v22 }
 0x412   :  { %v1113_v7 = vpop.permute.xlu2 %1112 }
 0x41a   :  { %v1127_v15 = vpop.permute.xlu2 %1126 }
 0x41d   :  { %v1088_v42 = vpop.f32.mrf.mxu3 }
 0x41f   :  { %v1031_v2 = vpop.f32.mrf.mxu0 }
 0x420   :  { %1134 = vrot.lane.b32.xlu0 %v1031_v2, %s1489_s13  ;;  %v1050_v36 = vpop.f32.mrf.mxu1 }
 0x421   :  { %1136 = vrot.lane.b32.xlu2 %v1050_v36, %s1489_s13 }
 0x425   :  { %v1090_v17 = vpop.f32.mrf.mxu3 }
 0x427   :  { %v1033_v25 = vpop.f32.mrf.mxu0 }
 0x428   :  { %1144 = vrot.lane.b32.xlu0 %v1088_v42, %s1488_s12  ;;  %v1052_v3 = vpop.f32.mrf.mxu1 }
 0x42a   :  { %v1105_v4 = vpop.permute.xlu1 %1104 }
 0x42b   :  { %v1152_v16 = vsel %vm1150_vm3, %v1149_v20, %v1105_v4 }
 0x42c   :  { %v1103_v6 = vpop.permute.xlu0 %1102  ;;  %v1155_v47 = vsel %vm1153_vm4, %v1152_v16, %v1113_v7 }
 0x432   :  { %v1095_v5 = vpop.permute.xlu1 %1094 }
 0x433   :  { %v1148_v24 = vsel %vm198_vm1, %v803_v38, %v1095_v5 }
 0x434   :  { %v1151_v30 = vsel %vm1150_vm3, %v1148_v24, %v1103_v6 }
 0x43b   :  { %v1121_v10 = vpop.permute.xlu0 %1120 }
 0x43c   :  { %v1119_v13 = vpop.permute.xlu1 %1118  ;;  %v1158_v23 = vsel %vm1156_vm5, %v1155_v47, %v1121_v10 }
 0x443   :  { %v1111_v40 = vpop.permute.xlu0 %1110 }
 0x444   :  { %v1129_v34 = vpop.permute.xlu1 %1128  ;;  %v1154_v14 = vsel %vm1153_vm4, %v1151_v30, %v1111_v40 }
 0x445   :  { %v1157_v45 = vsel %vm1156_vm5, %v1154_v14, %v1119_v13  ;;  %v1161_v37 = vsel %vm1159_vm6, %v1158_v23, %v1129_v34 }
 0x446   :  { %v1160_v35 = vsel %vm1159_vm6, %v1157_v45, %v1127_v15 }
 0x44c   :  { %v1143_v43 = vpop.permute.xlu1 %1142 }
 0x47b   :  { %v1137_v51 = vpop.permute.xlu2 %1136 }
 0x47c   :  { %v1164_v46 = vsel %vm1162_vm8, %v1161_v37, %v1137_v51 }
 0x492   :  { %v1135_v62 = vpop.permute.xlu0 %1134 }
 0x493   :  { %v1163_v50 = vsel %vm1162_vm8, %v1160_v35, %v1135_v62 }
 0x494   :  { %v1166_v32 = vsel %vm1165_vm7, %v1163_v50, %v1143_v43 }
 0x495   :  { %1168 = vst.msk [vmem:[#allocation8] sm:$0xff] %vm114_vm0, %v1166_v32 }
 0x49a   :  { %v1145_v55 = vpop.permute.xlu0 %1144 }
 0x49b   :  { %v1167_v58 = vsel %vm1165_vm7, %v1164_v46, %v1145_v55 }
 0x49c   :  { %1169 = vst.msk [vmem:[#allocation8 + $0x8] sm:$0xff] %vm114_vm0, %v1167_v58 }
 0x49d   :  { %1182 = dma.vmem_to_hbm [thread:$0]  %s1175_s15, 256, %s1177_s18, [#allocation4], %s1471_s20, %s1471_s20, %s1472_s21  }
 0x49e   :  { %1468 = dma.done.wait [#allocation4], 256  }
 0x49f   :  { %1469 = vsyncadd [#allocation4], 4294967040 }
 0x4a0   :  { %1187 = vsyncpa [#allocation3], 1 }
 0x4a1   :  { %1188 = vsyncpa [#allocation6], 1 }
 0x4a2   :  { %1189 = vsyncpa [#allocation4], 1 }

</bundles_post_ra>
